<compile_context>
chip_gen: v7x
topology: tpu7x:2x2x1
jax: 0.10.0
libtpu: 0.0.40
codegen_flags: <defaults>
</compile_context>

<pallas_src>
import functools

import jax
import jax.numpy as jnp
from jax.experimental import pallas as pl
from jax.experimental.pallas import tpu as pltpu


def _round_up(x: int, m: int) -> int:
    return ((x + m - 1) // m) * m


def _base_model_kernel(x_ref, w_ref, b_ref, logits_ref, pred_ref, *, num_classes):
    """Fused forward (logits) + predict (argmax over dim=1) for one batch tile."""
    # In-kernel f32 -> bf16 cast (VPU, overlapped with DMA); f32 MXU accumulation.
    x_bf16 = x_ref[...].astype(jnp.bfloat16)
    logits = jnp.dot(x_bf16, w_ref[...],
                     preferred_element_type=jnp.float32) + b_ref[...]

    # Store only the valid class columns (exact output shape; narrow masked store,
    # ~4*num_classes bytes/row instead of a full 128-lane padded row).
    logits_ref[...] = logits[:, :num_classes]

    # predict = argmax(logits[:, :num_classes], dim=1), first-occurrence tie-break
    # (matches torch.argmax).  Padded lanes (zero weight/bias columns) -> -inf.
    n_pad = logits.shape[1]
    ids = jax.lax.broadcasted_iota(jnp.int32, logits.shape, 1)
    valid = ids < num_classes
    masked = jnp.where(valid, logits, -jnp.inf)
    max_v = jnp.max(masked, axis=1, keepdims=True)
    is_max = masked == max_v
    pred_ref[...] = jnp.min(
        jnp.where(is_max, ids, jnp.int32(n_pad)), axis=1, keepdims=True
    ).astype(jnp.int32)


def base_model_forward_predict(x_nchw, weight, bias, *, tb: int = 2048):
    """
    x_nchw : [B, C, H, W] float32  (PyTorch NCHW convention)
    weight : [D, num_classes] float32, D = C*H*W
    bias   : [num_classes] float32
    tb     : max batch-tile rows per grid step (auto-shrunk for VMEM / megacore).
    Returns (logits [B, num_classes] float32, preds [B] int32).
    """
    B = x_nchw.shape[0]
    D = weight.shape[0]
    num_classes = weight.shape[1]

    LANE, SUB = 128, 8
    n_pad = max(LANE, _round_up(num_classes, LANE))   # lane-dense class dim for the MXU

    # ---- batch tile selection ----
    # Cap so each f32 x buffer stays <= ~8 MiB (16 MiB double-buffered) regardless of D.
    tb_cap = max(SUB, (((8 << 20) // (D * 4)) // SUB) * SUB)
    tb_eff = min(tb, tb_cap)
    if B <= SUB:
        # Single block whose dims equal the array dims (always a legal tiling).
        tb_eff = B
    else:
        # Megacore guard: prefer >= 4 grid steps (2 TCs x double-buffer on v7x).
        per_step = _round_up(-(-B // 4), SUB)
        tb_eff = max(SUB, min(tb_eff, per_step))
    grid = (pl.cdiv(B, tb_eff),)

    # Flatten like torch .view(B, -1); x stays float32 (cast happens in-kernel).
    x2d = x_nchw.reshape(B, D)

    # One-time, tiny weight/bias lane padding (bf16 weight for the MXU).
    w_p = weight.astype(jnp.bfloat16)
    b_p = bias.astype(jnp.float32)
    if n_pad != num_classes:
        w_p = jnp.pad(w_p, ((0, 0), (0, n_pad - num_classes)))
        b_p = jnp.pad(b_p, (0, n_pad - num_classes))
    b2d = b_p.reshape(1, n_pad)

    kernel = functools.partial(_base_model_kernel, num_classes=num_classes)

    # VMEM budget: double-buffered f32 x tile + outputs + resident weight/bias.
    vmem_bytes = (2 * tb_eff * D * 4
                  + 2 * tb_eff * num_classes * 4
                  + 2 * tb_eff * 4
                  + D * n_pad * 2
                  + n_pad * 4)
    vmem_limit = min(max(int(vmem_bytes * 1.5) + (4 << 20), 32 << 20), 48 << 20)

    cost = pl.CostEstimate(
        flops=2 * B * D * n_pad,
        transcendentals=0,
        bytes_accessed=(B * D * 4            # x (f32)
                        + D * n_pad * 2      # weight (bf16)
                        + n_pad * 4          # bias
                        + B * num_classes * 4  # logits
                        + B * 4),            # preds
    )

    logits, pred2d = pl.pallas_call(
        kernel,
        out_shape=(
            jax.ShapeDtypeStruct((B, num_classes), jnp.float32),
            jax.ShapeDtypeStruct((B, 1), jnp.int32),
        ),
        grid_spec=pltpu.PrefetchScalarGridSpec(
            num_scalar_prefetch=0,
            grid=grid,
            in_specs=[
                # x: tiled along batch -> double-buffered / pipelined DMA.
                pl.BlockSpec((tb_eff, D), lambda i: (i, 0)),
                # weight & bias: VMEM-resident across all grid steps.
                pl.BlockSpec((D, n_pad), lambda i: (0, 0)),
                pl.BlockSpec((1, n_pad), lambda i: (0, 0)),
            ],
            out_specs=[
                pl.BlockSpec((tb_eff, num_classes), lambda i: (i, 0)),
                pl.BlockSpec((tb_eff, 1), lambda i: (i, 0)),
            ],
        ),
        compiler_params=pltpu.CompilerParams(
            dimension_semantics=("parallel",),
            vmem_limit_bytes=vmem_limit),
        cost_estimate=cost,
    )(x2d, w_p, b2d)

    # TODO(synk): if D grows beyond the VMEM budget, add a trailing "arbitrary"
    # K-reduction grid axis with an f32 VMEM accumulator and pl.when init/finalize.
    return logits, pred2d[:, 0]


# TODO(synk): BaseModel.save / BaseModel.load / get_config are checkpoint I/O &
# metadata with no kernel-side equivalent; intentionally not reproduced here.

if __name__ == "__main__":
    # Small shapes consistent with a taxonomy-classification forward:
    # batch=2, channels=4, spatial=16x16, num_classes=10.
    B, C, H, W = 2, 4, 16, 16
    num_classes = 10
    D = C * H * W

    key = jax.random.PRNGKey(0)
    kx, kw, kb = jax.random.split(key, 3)
    x = jax.random.normal(kx, (B, C, H, W), dtype=jnp.float32)
    weight = jax.random.normal(kw, (D, num_classes), dtype=jnp.float32) * 0.02
    bias = jax.random.normal(kb, (num_classes,), dtype=jnp.float32) * 0.01

    logits, preds = base_model_forward_predict(x, weight, bias)
    jax.block_until_ready((logits, preds))

    x2d = x.reshape(B, D)

    # Reference with the same bf16-input / f32-accumulate precision as the kernel.
    ref_bf16 = jnp.dot(x2d.astype(jnp.bfloat16), weight.astype(jnp.bfloat16),
                       preferred_element_type=jnp.float32) + bias
    assert logits.shape == (B, num_classes)
    assert jnp.allclose(logits, ref_bf16, atol=1e-3, rtol=1e-3), "logits mismatch (bf16 ref)"

    # Loose check against the full-f32 reference (semantic sanity).
    ref_f32 = x2d @ weight + bias
    assert jnp.allclose(logits, ref_f32, atol=5e-2, rtol=5e-2), "logits mismatch (f32 ref)"

    # predict semantics: argmax over dim=1 of the logits the model produced.
    ref_preds = jnp.argmax(logits, axis=1)
    assert preds.shape == (B,)
    assert jnp.array_equal(preds, ref_preds), "preds mismatch"

    print("KERNEL_OK")
</pallas_src>

<mosaic_0001>
module attributes {stable_mosaic.version = 11 : i64} {
  func.func @_base_model_kernel(%arg0: i32, %arg1: memref<2x1024xf32, #tpu.memory_space<vmem>>, %arg2: memref<1024x128xbf16, #tpu.memory_space<vmem>>, %arg3: memref<1x128xf32, #tpu.memory_space<vmem>>, %arg4: memref<2x10xf32, #tpu.memory_space<vmem>>, %arg5: memref<2x1xi32, #tpu.memory_space<vmem>>) attributes {dimension_semantics = [#tpu.dimension_semantics<parallel>], iteration_bounds = array<i64: 1>, scalar_prefetch = 0 : i64, scratch_operands = 0 : i64, tpu.core_type = #tpu.core_type<tc>, window_params = [{transform_indices = @transform_0, window_bounds = array<i64: 2, 1024>}, {pipeline_mode = #tpu.pipeline_mode<synchronous>, transform_indices = @transform_1, window_bounds = array<i64: 1024, 128>}, {pipeline_mode = #tpu.pipeline_mode<synchronous>, transform_indices = @transform_2, window_bounds = array<i64: 1, 128>}, {transform_indices = @transform_3, window_bounds = array<i64: 2, 10>}, {transform_indices = @transform_4, window_bounds = array<i64: 2, 1>}]} {
    %c0 = arith.constant 0 : index
    %c0_0 = arith.constant 0 : index
    %0 = vector.load %arg1[%c0, %c0_0] : memref<2x1024xf32, #tpu.memory_space<vmem>>, vector<2x1024xf32>
    %1 = arith.truncf %0 : vector<2x1024xf32> to vector<2x1024xbf16>
    %c0_1 = arith.constant 0 : index
    %c0_2 = arith.constant 0 : index
    %2 = vector.load %arg2[%c0_1, %c0_2] : memref<1024x128xbf16, #tpu.memory_space<vmem>>, vector<1024x128xbf16>
    %cst = arith.constant dense<0.000000e+00> : vector<2x128xf32>
    %3 = tpu.matmul %1, %2, %cst {dimension_numbers = #tpu.dot_dimension_numbers<[1], [0], [0], [1], [0, 0, 1, 1], [], []>} : vector<2x1024xbf16>, vector<1024x128xbf16>, vector<2x128xf32> -> vector<2x128xf32>
    %c0_3 = arith.constant 0 : index
    %c0_4 = arith.constant 0 : index
    %4 = vector.load %arg3[%c0_3, %c0_4] : memref<1x128xf32, #tpu.memory_space<vmem>>, vector<1x128xf32>
    %5 = vector.broadcast %4 : vector<1x128xf32> to vector<2x128xf32>
    %6 = arith.addf %3, %5 : vector<2x128xf32>
    %7 = vector.extract_strided_slice %6 {offsets = [0, 0], sizes = [2, 10], strides = [1, 1]} : vector<2x128xf32> to vector<2x10xf32>
    %c0_5 = arith.constant 0 : index
    %c0_6 = arith.constant 0 : index
    %8 = vector.load %arg4[%c0_5, %c0_6] : memref<2x10xf32, #tpu.memory_space<vmem>>, vector<2x10xf32>
    tpu.vector_store %arg4[%c0_5, %c0_6], %7 {strides = array<i32>} : memref<2x10xf32, #tpu.memory_space<vmem>>, vector<2x10xf32>,
    %9 = tpu.iota {dimensions = array<i32: 1>} : vector<2x128xi32>
    %c10_i32 = arith.constant 10 : i32
    %10 = vector.broadcast %c10_i32 : i32 to vector<2x128xi32>
    %11 = arith.cmpi slt, %9, %10 : vector<2x128xi32>
    %cst_7 = arith.constant 0xFF800000 : f32
    %12 = vector.broadcast %cst_7 : f32 to vector<2x128xf32>
    %13 = arith.select %11, %6, %12 : vector<2x128xi1>, vector<2x128xf32>
    %cst_8 = arith.constant dense<0xFF800000> : vector<2xf32>
    %14 = vector.multi_reduction <maximumf>, %13, %cst_8 [1] : vector<2x128xf32> to vector<2xf32>
    %15 = vector.shape_cast %14 : vector<2xf32> to vector<2x1xf32>
    %16 = vector.broadcast %15 : vector<2x1xf32> to vector<2x128xf32>
    %17 = arith.cmpf oeq, %13, %16 : vector<2x128xf32>
    %c128_i32 = arith.constant 128 : i32
    %18 = vector.broadcast %c128_i32 : i32 to vector<2x128xi32>
    %19 = arith.select %17, %9, %18 : vector<2x128xi1>, vector<2x128xi32>
    %cst_9 = arith.constant dense<2147483647> : vector<2xi32>
    %20 = vector.multi_reduction <minsi>, %19, %cst_9 [1] : vector<2x128xi32> to vector<2xi32>
    %21 = vector.shape_cast %20 : vector<2xi32> to vector<2x1xi32>
    %c0_10 = arith.constant 0 : index
    %c0_11 = arith.constant 0 : index
    %22 = vector.load %arg5[%c0_10, %c0_11] : memref<2x1xi32, #tpu.memory_space<vmem>>, vector<2x1xi32>
    tpu.vector_store %arg5[%c0_10, %c0_11], %21 {strides = array<i32>} : memref<2x1xi32, #tpu.memory_space<vmem>>, vector<2x1xi32>,
    return
  }
  func.func @transform_0(%arg0: i32) -> (i32, i32) {
    %c0_i32 = arith.constant 0 : i32
    %c0_i32_0 = arith.constant 0 : i32
    return %arg0, %c0_i32 : i32, i32
  }
  func.func @transform_1(%arg0: i32) -> (i32, i32) {
    %c0_i32 = arith.constant 0 : i32
    %c0_i32_0 = arith.constant 0 : i32
    %c0_i32_1 = arith.constant 0 : i32
    return %c0_i32, %c0_i32_0 : i32, i32
  }
  func.func @transform_2(%arg0: i32) -> (i32, i32) {
    %c0_i32 = arith.constant 0 : i32
    %c0_i32_0 = arith.constant 0 : i32
    %c0_i32_1 = arith.constant 0 : i32
    return %c0_i32, %c0_i32_0 : i32, i32
  }
  func.func @transform_3(%arg0: i32) -> (i32, i32) {
    %c0_i32 = arith.constant 0 : i32
    %c0_i32_0 = arith.constant 0 : i32
    return %arg0, %c0_i32 : i32, i32
  }
  func.func @transform_4(%arg0: i32) -> (i32, i32) {
    %c0_i32 = arith.constant 0 : i32
    %c0_i32_0 = arith.constant 0 : i32
    return %arg0, %c0_i32 : i32, i32
  }
}

</mosaic_0001>

<bundles_post_ra>
// kernel: tpu_custom_call.1
= control target key start
LH: loop header
LB: loop body
LE: loop exit
PB: predicated region body
PF: predicated region fallthrough
CT: control target
= control target key end

     0   :  { %10 = vsyncpa [#allocation3], 0  ;;  %s1211_s0 = inlined_call_operand.hbm [shape: f32[2,1024], index: 0, kind: input, shape index: {}]   ;;  %s1212_s1 = inlined_call_operand.hbm [shape: bf16[1024,128], index: 1, kind: input, shape index: {}]   ;;  %s1213_s2 = inlined_call_operand.vmem [shape: f32[1,128], index: 2, kind: input, shape index: {}]   ;;  %s1214_s3 = inlined_call_operand.hbm [shape: f32[2,10], index: 3, kind: output, shape index: {0}]   ;;  %s1215_s4 = inlined_call_operand.vmem [shape: s32[2,1], index: 4, kind: output, shape index: {1}]  }
   0x1   :  { %11 = vsyncpa [#allocation6], 0 }
   0x2   :  { %12 = vsyncpa [#allocation4], 0  ;;  %s1123_s15 = smov [#allocation2]   ;;  %s1124_s17 = smov [#allocation5]  }
   0x3   :  { %s19_s16 = sshll.u32 %s1123_s15, 4  ;;  %s28_s18 = sshll.u32 %s1124_s17, 4  ;;  %s20_s16 = int_to_ptr.vmem [resolvable:$true] %s19_s16  ;;  %s1154_s18 = int_to_ptr.vmem [resolvable:$true] %s28_s18 }
   0x4   :  { %s1051_s21 = scalar_lea.hbm %s1211_s0, 256 }
   0x5   :  { %p1052_p0 = scmp.ne.s32.totalorder %s1211_s0, %s1051_s21  ;;  %p1055_p1 = scmp.lt.u32.totalorder %s1051_s21, %s1211_s0 }
   0x7   :  { %p1057_p2 = pnand %p1055_p1, %p1052_p0 }
   0x9   :  { %1060 = shalt.err (!%p1057_p2)
}
   0xa   :  { %s1061_s26 = scalar_lea.vmem %s20_s16, 256  ;;  %p1066_p4 = scmp.lt.s32.totalorder %s20_s16, %s20_s16 }
   0xb   :  { %p1062_p3 = scmp.ne.s32.totalorder %s20_s16, %s1061_s26  ;;  %p1067_p5 = scmp.lt.s32.totalorder %s1061_s26, %s1061_s26 }
   0xd   :  { %p1068_p6 = por %p1067_p5, %p1066_p4 }
   0xf   :  { %p1069_p7 = pnand %p1068_p6, %p1062_p3 }
  0x11   :  { %1072 = shalt.err (!%p1069_p7)
}
  0x12   :  { %22 = dma.hbm_to_vmem [thread:$0]  %s1211_s0, 256, %s20_s16, [#allocation3]  }
  0x13   :  { %s1073_s5 = scalar_lea.hbm %s1212_s1, 8192 }
  0x14   :  { %p1074_p8 = scmp.ne.s32.totalorder %s1212_s1, %s1073_s5  ;;  %p1077_p9 = scmp.lt.u32.totalorder %s1073_s5, %s1212_s1 }
  0x16   :  { %p1079_p10 = pnand %p1077_p9, %p1074_p8 }
  0x18   :  { %1082 = shalt.err (!%p1079_p10)
}
  0x19   :  { %s1083_s10 = scalar_lea.vmem %s1154_s18, 8192  ;;  %p1088_p12 = scmp.lt.s32.totalorder %s1154_s18, %s1154_s18 }
  0x1a   :  { %p1084_p11 = scmp.ne.s32.totalorder %s1154_s18, %s1083_s10  ;;  %p1089_p13 = scmp.lt.s32.totalorder %s1083_s10, %s1083_s10 }
  0x1c   :  { %p1090_p0 = por %p1089_p13, %p1088_p12 }
  0x1e   :  { %p1091_p1 = pnand %p1090_p0, %p1084_p11 }
  0x20   :  { %1094 = shalt.err (!%p1091_p1)
}
  0x21   :  { %s1125_s0 = smov 64   ;;  %s1126_s11 = smov 4  }
  0x22   :  { %34 = dma.hbm_to_vmem [thread:$0]  %s1212_s1, 8192, %s1154_s18, [#allocation6], %s1125_s0, %s1125_s0, %s1126_s11  }
  0x23   :  { %1117 = dma.done.wait [#allocation3], 256  }
  0x24   :  { %1118 = vsyncadd [#allocation3], 4294967040 }
  0x25   :  { %1119 = dma.done.wait [#allocation6], 8192  }
  0x26   :  { %1120 = vsyncadd [#allocation6], 4294959104  ;;  %v985_v0 = vld [vmem:[#allocation5 + $0x40] sm:$0xff]   ;;  %v989_v4 = vld [vmem:[#allocation5 + $0x48] sm:$0xff]   ;;  %v1127_v22 = vmov 1983009808   ;;  %v52_v24 = vlaneseq }
  0x27   :  { %v986_v1 = vld [vmem:[#allocation5 + $0xc0] sm:$0xff]   ;;  %891 = vmatprep.subr.bf16.mxu0 %v985_v0  ;;  %v990_v5 = vld [vmem:[#allocation5 + $0xc8] sm:$0xff]   ;;  %v993_v8 = vld [vmem:[#allocation5 + $0x50] sm:$0xff]   ;;  %v50_v23 = vunpack.c.l.s4 %v1127_v22  ;;  %vm777_vm1 = vcmask 74752   ;;  %vm783_vm2 = vcmask 1041408  }
  0x28   :  { %v987_v2 = vld [vmem:[#allocation5] sm:$0xff]   ;;  %913 = vmatprep.subr.bf16.mxu1 %v986_v1  ;;  %v991_v6 = vld [vmem:[#allocation5 + $0x8] sm:$0xff]   ;;  %v994_v9 = vld [vmem:[#allocation5 + $0xd0] sm:$0xff]   ;;  %v53_v30 = vshrl.u32 %v52_v24, 7 }
  0x29   :  { %v988_v3 = vld [vmem:[#allocation5 + $0x80] sm:$0xff]   ;;  %892 = vmatpush3.bf16.msra.mxu0 %v987_v2  ;;  %v992_v7 = vld [vmem:[#allocation5 + $0x88] sm:$0xff]   ;;  %v995_v10 = vld [vmem:[#allocation5 + $0x10] sm:$0xff]   ;;  %v51_v29 = vunpack.c.0.s8 %v50_v23 }
  0x2a   :  { %914 = vmatpush3.bf16.msra.mxu1 %v988_v3  ;;  %893 = vmatprep.subr.bf16.mxu0 %v989_v4  ;;  %v996_v11 = vld [vmem:[#allocation5 + $0x90] sm:$0xff]   ;;  %v997_v12 = vld [vmem:[#allocation5 + $0x58] sm:$0xff]   ;;  %v1001_v16 = vld [vmem:[#allocation5 + $0x60] sm:$0xff]  }
  0x2b   :  { %915 = vmatprep.subr.bf16.mxu1 %v990_v5  ;;  %v998_v13 = vld [vmem:[#allocation5 + $0xd8] sm:$0xff]   ;;  %v1002_v17 = vld [vmem:[#allocation5 + $0xe0] sm:$0xff]   ;;  %v1005_v20 = vld [vmem:[#allocation5 + $0x68] sm:$0xff]   ;;  %v1186_v35 = vsub.s32 %v51_v29, %v53_v30 }
  0x2c   :  { %v999_v14 = vld [vmem:[#allocation5 + $0x18] sm:$0xff]   ;;  %v1003_v18 = vld [vmem:[#allocation5 + $0x20] sm:$0xff]   ;;  %v1006_v21 = vld [vmem:[#allocation5 + $0xe8] sm:$0xff]  }
  0x2d   :  { %894 = vmatpush3.bf16.msra.mxu0 %v991_v6  ;;  %v1000_v15 = vld [vmem:[#allocation5 + $0x98] sm:$0xff]   ;;  %v1004_v19 = vld [vmem:[#allocation5 + $0xa0] sm:$0xff]   ;;  %v1007_v25 = vld [vmem:[#allocation5 + $0x28] sm:$0xff]  }
  0x2e   :  { %916 = vmatpush3.bf16.msra.mxu1 %v992_v7  ;;  %895 = vmatprep.subr.bf16.mxu0 %v993_v8  ;;  %v1008_v26 = vld [vmem:[#allocation5 + $0xa8] sm:$0xff]   ;;  %v1009_v27 = vld [vmem:[#allocation5 + $0x70] sm:$0xff]   ;;  %v1013_v33 = vld [vmem:[#allocation5 + $0x78] sm:$0xff]  }
  0x2f   :  { %917 = vmatprep.subr.bf16.mxu1 %v994_v9  ;;  %v1010_v28 = vld [vmem:[#allocation5 + $0xf0] sm:$0xff]   ;;  %v1014_v34 = vld [vmem:[#allocation5 + $0xf8] sm:$0xff]   ;;  %v1018_v41 = vld [vmem:[#allocation5 + $0x140] sm:$0xff]  }
  0x30   :  { %v1011_v31 = vld [vmem:[#allocation5 + $0x30] sm:$0xff]   ;;  %v1015_v36 = vld [vmem:[#allocation5 + $0x38] sm:$0xff]   ;;  %v1019_v42 = vld [vmem:[#allocation5 + $0x1c0] sm:$0xff]  }
  0x31   :  { %896 = vmatpush3.bf16.msra.mxu0 %v995_v10  ;;  %v1012_v32 = vld [vmem:[#allocation5 + $0xb0] sm:$0xff]   ;;  %v1016_v37 = vld [vmem:[#allocation5 + $0xb8] sm:$0xff]   ;;  %v1020_v48 = vld [vmem:[#allocation5 + $0x100] sm:$0xff]  }
  0x32   :  { %918 = vmatpush3.bf16.msra.mxu1 %v996_v11  ;;  %897 = vmatprep.subr.bf16.mxu0 %v997_v12  ;;  %v44_v38 = vld [vmem:[#allocation2] sm:$0xff]  ;;  %v1022_v50 = vld [vmem:[#allocation5 + $0x148] sm:$0xff]   ;;  %v1021_v52 = vld [vmem:[#allocation5 + $0x180] sm:$0xff]  }
  0x33   :  { %919 = vmatprep.subr.bf16.mxu1 %v998_v13  ;;  %v55_v39 = vrot.slane %v44_v38, %v1186_v35  ;;  %v48_v40 = vcombine.high %v44_v38, %v44_v38  ;;  %v1023_v53 = vld [vmem:[#allocation5 + $0x1c8] sm:$0xff]   ;;  %v1026_v55 = vld [vmem:[#allocation5 + $0x150] sm:$0xff]   ;;  %v1030_v59 = vld [vmem:[#allocation5 + $0x158] sm:$0xff]  }
  0x34   :  { %v1024_v54 = vld [vmem:[#allocation5 + $0x108] sm:$0xff]   ;;  %v1027_v57 = vld [vmem:[#allocation5 + $0x1d0] sm:$0xff]   ;;  %v1031_v61 = vld [vmem:[#allocation5 + $0x1d8] sm:$0xff]  }
  0x35   :  { %898 = vmatpush3.bf16.msra.mxu0 %v999_v14  ;;  %v63_v43 = vcombine.high %v55_v39, %v55_v39  ;;  %v62_v44 = vrot.slane %v48_v40, %v1186_v35  ;;  %v90_v45 = vpack.c.bf16 %v55_v39, %v55_v39  ;;  %v1025_v56 = vld [vmem:[#allocation5 + $0x188] sm:$0xff]   ;;  %v1028_v58 = vld [vmem:[#allocation5 + $0x110] sm:$0xff]   ;;  %v1032_v62 = vld [vmem:[#allocation5 + $0x118] sm:$0xff]  }
  0x36   :  { %920 = vmatpush3.bf16.msra.mxu1 %v1000_v15  ;;  %899 = vmatprep.subr.bf16.mxu0 %v1001_v16  ;;  %v1029_v60 = vld [vmem:[#allocation5 + $0x190] sm:$0xff]   ;;  %v1034_v63 = vld [vmem:[#allocation5 + $0x160] sm:$0xff]   ;;  %v1033_v0 = vld [vmem:[#allocation5 + $0x198] sm:$0xff]  }
  0x37   :  { %921 = vmatprep.subr.bf16.mxu1 %v1002_v17  ;;  %v91_v46 = vpack.c.bf16 %v63_v43, %v63_v43  ;;  %v64_v47 = vcombine.high %v62_v44, %v62_v44  ;;  %v92_v49 = vpack.c.bf16 %v62_v44, %v62_v44  ;;  %v1035_v1 = vld [vmem:[#allocation5 + $0x1e0] sm:$0xff]   ;;  %v1038_v3 = vld [vmem:[#allocation5 + $0x168] sm:$0xff]   ;;  %v1042_v7 = vld [vmem:[#allocation5 + $0x170] sm:$0xff]  }
  0x38   :  { %v1036_v2 = vld [vmem:[#allocation5 + $0x120] sm:$0xff]   ;;  %v1039_v5 = vld [vmem:[#allocation5 + $0x1e8] sm:$0xff]   ;;  %v1043_v9 = vld [vmem:[#allocation5 + $0x1f0] sm:$0xff]  }
  0x39   :  { %900 = vmatpush3.bf16.msra.mxu0 %v1003_v18  ;;  %649 = vmatprep.mubr.bf16.mxu0 %v91_v46  ;;  %v93_v51 = vpack.c.bf16 %v64_v47, %v64_v47  ;;  %v1037_v4 = vld [vmem:[#allocation5 + $0x1a0] sm:$0xff]   ;;  %v1040_v6 = vld [vmem:[#allocation5 + $0x128] sm:$0xff]   ;;  %v1044_v10 = vld [vmem:[#allocation5 + $0x130] sm:$0xff]  }
  0x3a   :  { %922 = vmatpush3.bf16.msra.mxu1 %v1004_v19  ;;  %901 = vmatprep.subr.bf16.mxu0 %v1005_v20  ;;  %v1041_v8 = vld [vmem:[#allocation5 + $0x1a8] sm:$0xff]   ;;  %v1046_v11 = vld [vmem:[#allocation5 + $0x178] sm:$0xff]   ;;  %v1045_v12 = vld [vmem:[#allocation5 + $0x1b0] sm:$0xff]  }
  0x3b   :  { %923 = vmatprep.subr.bf16.mxu1 %v1006_v21  ;;  %689 = vmatprep.mubr.bf16.mxu1 %v93_v51  ;;  %v1047_v13 = vld [vmem:[#allocation5 + $0x1f8] sm:$0xff]  }
  0x3c   :  { %v45_v14 = vld [vmem:[#allocation2 + $0x8] sm:$0xff] }
  0x3d   :  { %902 = vmatpush3.bf16.msra.mxu0 %v1007_v25  ;;  %v1048_v15 = vld [vmem:[#allocation5 + $0x138] sm:$0xff]   ;;  %v72_v16 = vrot.slane %v45_v14, %v1186_v35  ;;  %v65_v17 = vcombine.high %v45_v14, %v45_v14 }
  0x3e   :  { %924 = vmatpush3.bf16.msra.mxu1 %v1008_v26  ;;  %903 = vmatprep.subr.bf16.mxu0 %v1009_v27  ;;  %v1049_v18 = vld [vmem:[#allocation5 + $0x1b8] sm:$0xff]  }
  0x3f   :  { %925 = vmatprep.subr.bf16.mxu1 %v1010_v28  ;;  %v80_v19 = vcombine.high %v72_v16, %v72_v16  ;;  %v79_v20 = vrot.slane %v65_v17, %v1186_v35  ;;  %v94_v21 = vpack.c.bf16 %v72_v16, %v72_v16  ;;  %v826_v28 = vld [vmem:[%s1213_s2] ss:$0 sm:$0xff]  ;;  %s1128_s2 = smov [#allocation7]  }
  0x40   :  { %s812_s15 = sshll.u32 %s1128_s2, 4  ;;  %s813_s15 = int_to_ptr.vmem [resolvable:$true] %s812_s15 }
  0x41   :  { %904 = vmatpush3.bf16.msra.mxu0 %v1011_v31  ;;  %v95_v22 = vpack.c.bf16 %v80_v19, %v80_v19  ;;  %v81_v23 = vcombine.high %v79_v20, %v79_v20  ;;  %v96_v25 = vpack.c.bf16 %v79_v20, %v79_v20  ;;  %s1095_s16 = scalar_lea.vmem %s813_s15, 32  ;;  %p1100_p3 = scmp.lt.s32.totalorder %s813_s15, %s813_s15 }
  0x42   :  { %926 = vmatpush3.bf16.msra.mxu1 %v1012_v32  ;;  %905 = vmatprep.subr.bf16.mxu0 %v1013_v33  ;;  %p1096_p2 = scmp.ne.s32.totalorder %s813_s15, %s1095_s16  ;;  %p1101_p4 = scmp.lt.s32.totalorder %s1095_s16, %s1095_s16 }
  0x43   :  { %927 = vmatprep.subr.bf16.mxu1 %v1014_v34  ;;  %v97_v26 = vpack.c.bf16 %v81_v23, %v81_v23 }
  0x44   :  { %p1102_p5 = por %p1101_p4, %p1100_p3 }
  0x45   :  { %906 = vmatpush3.bf16.msra.mxu0 %v1015_v36 }
  0x46   :  { %928 = vmatpush3.bf16.msra.mxu1 %v1016_v37  ;;  %935 = vmatprep.subr.bf16.mxu0 %v1018_v41  ;;  %p1103_p6 = pnand %p1102_p5, %p1096_p2 }
  0x47   :  { %957 = vmatprep.subr.bf16.mxu1 %v1019_v42  ;;  %v780_v42 = vand.u32 127, %v52_v24 }
  0x48   :  { %650 = vmatmul.mubr.bf16.vlgmr.msra.gmra.mrb[0].mxu0 %v90_v45 }
  0x49   :  { %936 = vmatpush3.bf16.msra.mxu0 %v1020_v48  ;;  %690 = vmatmul.mubr.bf16.vlgmr.msra.gmra.mrb[0].mxu1 %v92_v49  ;;  %vm781_vm0 = vcmp.lt.s32.totalorder %v780_v42, 10 }
  0x4a   :  { %937 = vmatprep.subr.bf16.mxu0 %v1022_v50  ;;  %958 = vmatpush3.bf16.msra.mxu1 %v1021_v52 }
  0x4b   :  { %959 = vmatprep.subr.bf16.mxu1 %v1023_v53  ;;  %729 = vmatprep.mubr.bf16.mxu0 %v95_v22 }
  0x4c   :  { %769 = vmatprep.mubr.bf16.mxu1 %v97_v26 }
  0x4d   :  { %938 = vmatpush3.bf16.msra.mxu0 %v1024_v54 }
  0x4e   :  { %939 = vmatprep.subr.bf16.mxu0 %v1026_v55  ;;  %960 = vmatpush3.bf16.msra.mxu1 %v1025_v56 }
  0x4f   :  { %961 = vmatprep.subr.bf16.mxu1 %v1027_v57 }
  0x51   :  { %940 = vmatpush3.bf16.msra.mxu0 %v1028_v58 }
  0x52   :  { %941 = vmatprep.subr.bf16.mxu0 %v1030_v59  ;;  %962 = vmatpush3.bf16.msra.mxu1 %v1029_v60 }
  0x53   :  { %963 = vmatprep.subr.bf16.mxu1 %v1031_v61 }
  0x55   :  { %942 = vmatpush3.bf16.msra.mxu0 %v1032_v62 }
  0x56   :  { %943 = vmatprep.subr.bf16.mxu0 %v1034_v63  ;;  %964 = vmatpush3.bf16.msra.mxu1 %v1033_v0 }
  0x57   :  { %965 = vmatprep.subr.bf16.mxu1 %v1035_v1 }
  0x59   :  { %944 = vmatpush3.bf16.msra.mxu0 %v1036_v2 }
  0x5a   :  { %945 = vmatprep.subr.bf16.mxu0 %v1038_v3  ;;  %966 = vmatpush3.bf16.msra.mxu1 %v1037_v4 }
  0x5b   :  { %967 = vmatprep.subr.bf16.mxu1 %v1039_v5 }
  0x5d   :  { %946 = vmatpush3.bf16.msra.mxu0 %v1040_v6 }
  0x5e   :  { %947 = vmatprep.subr.bf16.mxu0 %v1042_v7  ;;  %968 = vmatpush3.bf16.msra.mxu1 %v1041_v8 }
  0x5f   :  { %969 = vmatprep.subr.bf16.mxu1 %v1043_v9 }
  0x61   :  { %948 = vmatpush3.bf16.msra.mxu0 %v1044_v10 }
  0x62   :  { %949 = vmatprep.subr.bf16.mxu0 %v1046_v11  ;;  %970 = vmatpush3.bf16.msra.mxu1 %v1045_v12 }
  0x63   :  { %971 = vmatprep.subr.bf16.mxu1 %v1047_v13 }
  0x65   :  { %950 = vmatpush3.bf16.msra.mxu0 %v1048_v15 }
  0x66   :  { %972 = vmatpush3.bf16.msra.mxu1 %v1049_v18 }
  0x68   :  { %730 = vmatmul.mubr.bf16.vlgmr.msra.gmra.mrb[4].mxu0 %v94_v21 }
  0x69   :  { %770 = vmatmul.mubr.bf16.vlgmr.msra.gmra.mrb[4].mxu1 %v96_v25 }
 0x11b   :  { %v907_v27 = vpop.f32.mrb[0].mxu0 }
 0x11c   :  { %v908_v29 = vpop.f32.mrb[1].mxu0  ;;  %v929_v30 = vpop.f32.mrb[0].mxu1 }
 0x11d   :  { %v909_v31 = vadd.f32 %v908_v29, %v907_v27  ;;  %v910_v32 = vpop.f32.mrb[2].mxu0  ;;  %v930_v33 = vpop.f32.mrb[1].mxu1 }
 0x11e   :  { %v911_v34 = vpop.f32.mrb[3].mxu0  ;;  %v931_v36 = vadd.f32 %v930_v33, %v929_v30  ;;  %v932_v37 = vpop.f32.mrb[2].mxu1 }
 0x11f   :  { %v652_v35 = vadd.f32 %v909_v31, %v826_v28  ;;  %v933_v38 = vpop.f32.mrb[3].mxu1 }
 0x121   :  { %v692_v39 = vadd.f32 %v931_v36, %v652_v35 }
 0x13b   :  { %v951_v40 = vpop.f32.mrb[4].mxu0 }
 0x13c   :  { %v952_v41 = vpop.f32.mrb[5].mxu0  ;;  %v973_v43 = vpop.f32.mrb[4].mxu1 }
 0x13d   :  { %v953_v44 = vadd.f32 %v952_v41, %v951_v40  ;;  %v954_v45 = vpop.f32.mrb[6].mxu0  ;;  %v974_v46 = vpop.f32.mrb[5].mxu1 }
 0x13e   :  { %v955_v47 = vpop.f32.mrb[7].mxu0  ;;  %v975_v49 = vadd.f32 %v974_v46, %v973_v43  ;;  %v976_v50 = vpop.f32.mrb[6].mxu1 }
 0x13f   :  { %v732_v48 = vadd.f32 %v953_v44, %v692_v39  ;;  %v977_v51 = vpop.f32.mrb[7].mxu1 }
 0x141   :  { %v772_v52 = vadd.f32 %v975_v49, %v732_v48 }
 0x143   :  { %v782_v53 = vsel %vm781_vm0, %v772_v52, -inf  ;;  %778 = vst.msk [vmem:[#allocation7] sm:$0x3] %vm777_vm1, %v772_v52 }
 0x144   :  { %v784_v54 = vsel %vm783_vm2, %v782_v53, -inf }
 0x145   :  { %785 = vmax.xlane.f32.xlu0 %v784_v54 }
 0x1d2   :  { %v786_v55 = vpop.xlane.xlu0 %785 }
 0x1d3   :  { %vm787_vm3 = vcmp.eq.f32.partialorder %v782_v53, %v786_v55 }
 0x1d4   :  { %v788_v24 = vsel %vm787_vm3, %v780_v42, 128 }
 0x1d5   :  { %v789_v56 = vsel %vm783_vm2, %v788_v24, 2147483647 }
 0x1d6   :  { %v791_v57 = vshra.s32 %v789_v56, 16  ;;  %v790_v59 = vand.u32 65535, %v789_v56 }
 0x1d8   :  { %v793_v58 = vcvt.s32.f32 %v791_v57  ;;  %v792_v61 = vcvt.s32.f32 %v790_v59 }
 0x1da   :  { %794 = vmin.xlane.f32.xlu0 %v793_v58 }
 0x267   :  { %v795_v60 = vpop.xlane.xlu0 %794 }
 0x268   :  { %vm796_vm4 = vcmp.eq.f32.partialorder %v793_v58, %v795_v60 }
 0x269   :  { %v797_v62 = vsel %vm796_vm4, %v792_v61, inf }
 0x26a   :  { %798 = vmin.xlane.f32.xlu1 %v797_v62 }
 0x26b   :  { %1106 = shalt.err (!%p1103_p6)
}
 0x26c   :  { %s1107_s19 = scalar_lea.hbm %s1214_s3, 32 }
 0x26d   :  { %p1108_p7 = scmp.ne.s32.totalorder %s1214_s3, %s1107_s19  ;;  %p1111_p8 = scmp.lt.u32.totalorder %s1107_s19, %s1214_s3 }
 0x26f   :  { %p1113_p9 = pnand %p1111_p8, %p1108_p7 }
 0x271   :  { %1116 = shalt.err (!%p1113_p9)
}
 0x272   :  { %815 = dma.vmem_to_hbm [thread:$0]  %s813_s15, 32, %s1214_s3, [#allocation4]   ;;  %v801_v63 = vcvt.f32.s32 %v795_v60  ;;  %vm804_vm5 = vcmask 1024  }
 0x274   :  { %v802_v1 = vshll.u32 %v801_v63, 16 }
 0x2f7   :  { %v799_v0 = vpop.xlane.xlu1 %798 }
 0x2f8   :  { %v800_v2 = vcvt.f32.s32 %v799_v0 }
 0x2fa   :  { %v803_v3 = vadd.s32 %v802_v1, %v800_v2 }
 0x2fc   :  { %805 = vst.msk [vmem:[%s1215_s4] sm:$0x3] %vm804_vm5, %v803_v3 }
 0x2fd   :  { %1121 = dma.done.wait [#allocation4], 32  }
 0x2fe   :  { %1122 = vsyncadd [#allocation4], 4294967264 }
 0x2ff   :  { %823 = vsyncpa [#allocation3], 1 }
 0x300   :  { %824 = vsyncpa [#allocation6], 1 }
 0x301   :  { %825 = vsyncpa [#allocation4], 1 }

</bundles_post_ra>
